<compile_context>
chip_gen: v6e
topology: v6e:2x2x1
jax: 0.10.0
libtpu: 0.0.40
codegen_flags: <defaults>
</compile_context>

<pallas_src>
import jax
import jax.numpy as jnp
from jax.experimental import pallas as pl
from jax.experimental.pallas import tpu as pltpu


def _flatten_dma_kernel(x_hbm_ref, o_hbm_ref, sem):
    # One whole-array DMA, HBM -> HBM.  Issue and wait; the DMA engine
    # streams it at full HBM bandwidth with zero TensorCore vld/vst traffic.
    copy = pltpu.make_async_copy(x_hbm_ref, o_hbm_ref, sem)
    copy.start()
    copy.wait()


def flatten(x):
    """Pallas equivalent of torch Flatten: x.view(x.size(0), -1).

    x: (N, d1, d2, ...) -> (N, prod(d_i)), same dtype, row-major order,
    identical to PyTorch's .view semantics on a contiguous tensor.
    """
    n = x.shape[0]
    f = 1
    for d in x.shape[1:]:
        f *= d

    # Metadata-only rank collapse (same row-major order torch .view gives).
    x2d = jnp.reshape(x, (n, f))

    return pl.pallas_call(
        _flatten_dma_kernel,
        out_shape=jax.ShapeDtypeStruct((n, f), x.dtype),
        in_specs=[pl.BlockSpec(memory_space=pl.ANY)],
        out_specs=pl.BlockSpec(memory_space=pl.ANY),
        scratch_shapes=[pltpu.SemaphoreType.DMA],
    )(x2d)


if __name__ == "__main__":
    key = jax.random.PRNGKey(0)

    # Small NCHW input consistent with a conv-backbone feature map.
    x = jax.random.normal(key, (2, 4, 16, 16), dtype=jnp.float32)
    out = flatten(x)
    jax.block_until_ready(out)

    ref = x.reshape(x.shape[0], -1)
    assert out.shape == (2, 4 * 16 * 16), out.shape
    assert out.dtype == x.dtype
    assert bool(jnp.array_equal(out, ref))

    # Non-128-aligned feature size: DMA path is layout/alignment agnostic.
    key2 = jax.random.PRNGKey(1)
    y = jax.random.normal(key2, (2, 3, 5, 7), dtype=jnp.float32)
    out2 = flatten(y)
    jax.block_until_ready(out2)
    assert out2.shape == (2, 3 * 5 * 7)
    assert bool(jnp.array_equal(out2, y.reshape(y.shape[0], -1)))

    # bf16 path (sub-32-bit dtype packs fine through the DMA engine).
    z = jax.random.normal(jax.random.PRNGKey(2), (4, 8, 8, 8), dtype=jnp.bfloat16)
    out3 = flatten(z)
    jax.block_until_ready(out3)
    assert out3.shape == (4, 8 * 8 * 8)
    assert out3.dtype == jnp.bfloat16
    assert bool(jnp.array_equal(out3, z.reshape(z.shape[0], -1)))

    print("KERNEL_OK")
</pallas_src>

<mosaic_0001>
module attributes {stable_mosaic.version = 11 : i64} {
  func.func @_flatten_dma_kernel(%arg0: memref<2x1024xf32, #tpu.memory_space<any>>, %arg1: memref<2x1024xf32, #tpu.memory_space<any>>, %arg2: memref<!tpu.dma_semaphore, #tpu.memory_space<semaphore_mem>>) attributes {dimension_semantics = [], scalar_prefetch = 0 : i64, scratch_operands = 1 : i64, tpu.core_type = #tpu.core_type<tc>} {
    tpu.enqueue_dma source(%arg0 : memref<2x1024xf32, #tpu.memory_space<any>>) target(%arg1 : memref<2x1024xf32, #tpu.memory_space<any>>) target_semaphore(%arg2 : memref<!tpu.dma_semaphore, #tpu.memory_space<semaphore_mem>>)
    tpu.wait_dma2 semaphore(%arg2 : memref<!tpu.dma_semaphore, #tpu.memory_space<semaphore_mem>>) src(%arg0 : memref<2x1024xf32, #tpu.memory_space<any>>) dst(%arg1 : memref<2x1024xf32, #tpu.memory_space<any>>)
    return
  }
}

</mosaic_0001>

<bundles_post_ra>
// kernel: tpu_custom_call.1
= control target key start
LH: loop header
LB: loop body
LE: loop exit
PB: predicated region body
PF: predicated region fallthrough
CT: control target
= control target key end

     0   :  { %s29_s6 = smov [#allocation2]   ;;  %s30_s7 = smov 131072   ;;  %s48_s0 = inlined_call_operand.hbm [shape: f32[2,1024], index: 0, kind: input, shape index: {}]   ;;  %s49_s1 = inlined_call_operand.hbm [shape: f32[2,1024], index: 1, kind: output, shape index: {}]  }
   0x1   :  { %s31_s8 = smov 0  }
   0x2   :  { %12 = dma.general %s48_s0, 256, %s49_s1, %s29_s6, %s30_s7, [#allocation4], %s31_s8, 0  }
   0x3   :  { %27 = dma.done.wait [#allocation2], 256 }
   0x4   :  { %28 = vsyncadd [#allocation2], 4294967040 }
   0x5   :  { %17 = vsyncmov [#allocation2] }
   0x8   :  { %s18_s13 = vpop.sfrf %17 }
   0x9   :  { %p23_p0 = scmp.ne.s32.totalorder %s18_s13, 0 }
   0xb   :  { %22 = shalt.err (%p23_p0)  }

</bundles_post_ra>
